<compile_context>
chip_gen: v7x
topology: tpu7x:2x2x1
jax: 0.10.0
libtpu: 0.0.40
codegen_flags: <defaults>
</compile_context>

<pallas_src>
import jax
import jax.numpy as jnp
from jax.experimental import pallas as pl
from jax.experimental.pallas import tpu as pltpu

# Small, shape-consistent config (original: n_embed=384, n_head=4, block_size=512)
N_EMBED = 128
N_HEAD = 4
HEAD_SIZE = N_EMBED // N_HEAD
HIDDEN = 4 * N_EMBED
LN_EPS = 1e-5                 # nn.LayerNorm default eps
APPROX_RECIPROCAL = True      # exact-reciprocal fallback for tighter tolerance checks
NEG_INF = -1e30               # finite "-inf" for the causal mask / running max init


def _recip(x):
    if APPROX_RECIPROCAL:
        return pl.reciprocal(x, approx=True)
    return 1.0 / x


def _layernorm(x, gamma, beta):
    mu = jnp.mean(x, axis=-1, keepdims=True)
    var = jnp.mean((x - mu) ** 2, axis=-1, keepdims=True)
    return (x - mu) * jax.lax.rsqrt(var + LN_EPS) * gamma + beta


# --------------------- kernel 1: LN1 + fused QKV projection ---------------------
def ln_qkv_kernel(x_ref, g1_ref, b1_ref, wqkv_ref, qkv_ref):
    C = x_ref.shape[2]
    ln1 = _layernorm(x_ref[0], g1_ref[...], b1_ref[...]).astype(jnp.bfloat16)
    # Emit q / k / v column blocks separately: the f32 product stays (TR, C).
    for j in range(3):
        col = j * C
        qkv_ref[0, :, pl.ds(col, C)] = jnp.dot(
            ln1, wqkv_ref[:, pl.ds(col, C)],
            preferred_element_type=jnp.float32).astype(jnp.bfloat16)


# ------ kernel 2: causal MHA (online softmax) + residual + LN2 + MLP + residual ------
def attn_mlp_kernel(x_ref, qkv_ref, wp_ref, bp_ref, g2_ref, b2_ref,
                    w1_ref, bf1_ref, w2_ref, bf2_ref, o_ref,
                    sa_ref, m_ref, l_ref, acc_ref):
    qi = pl.program_id(1)
    TQ = o_ref.shape[1]
    C = x_ref.shape[2]
    q_start = pl.multiple_of(qi * TQ, TQ)

    # Mask needed only for the single diagonal key block: (TQ, TQ).
    row = jax.lax.broadcasted_iota(jnp.int32, (TQ, TQ), 0)
    col = jax.lax.broadcasted_iota(jnp.int32, (TQ, TQ), 1)
    upper = col > row

    n_kb = qi + 1                     # causal block skipping: only qi+1 key blocks live

    sa_ref[...] = jnp.zeros_like(sa_ref)

    for h in range(N_HEAD):           # static: head slice offsets stay compile-time constants
        hs = h * HEAD_SIZE
        q_h = qkv_ref[0, pl.ds(q_start, TQ), pl.ds(hs, HEAD_SIZE)]     # (TQ, HS) bf16 (pre-scaled)

        m_ref[...] = jnp.full_like(m_ref, NEG_INF)
        l_ref[...] = jnp.zeros_like(l_ref)
        acc_ref[...] = jnp.zeros_like(acc_ref)

        @pl.loop(0, n_kb)             # stream 128-wide key blocks with online softmax
        def _(kb):
            k_off = pl.multiple_of(kb * TQ, TQ)
            k_h = qkv_ref[0, pl.ds(k_off, TQ), pl.ds(C + hs, HEAD_SIZE)]       # (TQ, HS) bf16
            v_h = qkv_ref[0, pl.ds(k_off, TQ), pl.ds(2 * C + hs, HEAD_SIZE)]   # (TQ, HS) bf16
            s = jax.lax.dot_general(q_h, k_h, (((1,), (1,)), ((), ())),
                                    preferred_element_type=jnp.float32)        # (TQ, TQ) f32
            # Only the diagonal block needs the causal mask.
            s = jnp.where(jnp.logical_and(kb == qi, upper), NEG_INF, s)
            m_prev = m_ref[...]
            m_new = jnp.maximum(m_prev, jnp.max(s, axis=-1, keepdims=True))
            a = jnp.exp(m_prev - m_new)
            p = jnp.exp(s - m_new)
            l_ref[...] = a * l_ref[...] + jnp.sum(p, axis=-1, keepdims=True)
            acc_ref[...] = a * acc_ref[...] + jnp.dot(
                p.astype(jnp.bfloat16), v_h, preferred_element_type=jnp.float32)
            m_ref[...] = m_new
            # attention dropout: identity in eval mode

        out_h = acc_ref[...] * _recip(l_ref[...])                               # (TQ, HS) f32
        # Accumulate the output projection per head (no lane concat of 32-wide heads).
        sa_ref[...] += jnp.dot(out_h.astype(jnp.bfloat16),
                               wp_ref[pl.ds(hs, HEAD_SIZE), :],
                               preferred_element_type=jnp.float32)              # (TQ, C)

    # proj dropout: identity in eval mode
    x1 = x_ref[0] + sa_ref[...] + bp_ref[...]

    # ---- x + FeedForward(LayerNorm2(x)), hidden dim in 128-col chunks ----
    ln2 = _layernorm(x1, g2_ref[...], b2_ref[...]).astype(jnp.bfloat16)
    sa_ref[...] = jnp.zeros_like(sa_ref)       # reuse scratch as the ff accumulator
    FC = 128
    for c in range(HIDDEN // FC):
        off = c * FC
        h1 = jnp.dot(ln2, w1_ref[:, pl.ds(off, FC)],
                     preferred_element_type=jnp.float32) + bf1_ref[:, pl.ds(off, FC)]
        h1 = jnp.maximum(h1, 0.0)                                               # ReLU
        sa_ref[...] += jnp.dot(h1.astype(jnp.bfloat16), w2_ref[pl.ds(off, FC), :],
                               preferred_element_type=jnp.float32)
    # ffwd dropout: identity in eval mode
    o_ref[0] = x1 + sa_ref[...] + bf2_ref[...]


def block_forward(x, params):
    """x: (B, T, C) float32.  params: dict of pre-transposed f32 weights (in, out)."""
    B, T, C = x.shape
    assert C == N_EMBED
    TQ = min(128, T)
    assert T % TQ == 0 and TQ % 8 == 0, "sequence length must tile by the query tile"
    NQ = T // TQ

    # Fuse QKV weights; fold the (non-standard, matches PyTorch source) C**-0.5
    # attention scale into the Wq columns; cast matmul weights to bf16.
    scale = C ** (-0.5)
    wqkv = jnp.concatenate(
        [params["wq"] * scale, params["wk"], params["wv"]], axis=1
    ).astype(jnp.bfloat16)                                   # (C, 3C)
    wp = params["wp"].astype(jnp.bfloat16)                   # (C, C)
    w1 = params["w1"].astype(jnp.bfloat16)                   # (C, HIDDEN)
    w2 = params["w2"].astype(jnp.bfloat16)                   # (HIDDEN, C)

    # -------- kernel 1: LN1 + fused QKV (fully parallel grid) --------
    qkv_cost = pl.CostEstimate(
        flops=int(2 * B * T * C * 3 * C),
        transcendentals=int(B * T),
        bytes_accessed=int(4 * B * T * C + 2 * B * T * 3 * C + 2 * C * 3 * C + 8 * C))
    qkv = pl.pallas_call(
        ln_qkv_kernel,
        out_shape=jax.ShapeDtypeStruct((B, T, 3 * C), jnp.bfloat16),
        grid_spec=pltpu.PrefetchScalarGridSpec(
            num_scalar_prefetch=0,
            grid=(B, NQ),
            in_specs=[
                pl.BlockSpec((1, TQ, C), lambda b, r: (b, r, 0)),      # x rows
                pl.BlockSpec((1, C), lambda b, r: (0, 0)),             # ln1 gamma
                pl.BlockSpec((1, C), lambda b, r: (0, 0)),             # ln1 beta
                pl.BlockSpec((C, 3 * C), lambda b, r: (0, 0)),         # fused Wqkv (bf16)
            ],
            out_specs=pl.BlockSpec((1, TQ, 3 * C), lambda b, r: (b, r, 0)),
        ),
        compiler_params=pltpu.CompilerParams(
            dimension_semantics=("parallel", "parallel")),
        cost_estimate=qkv_cost,
    )(x, params["g1"], params["b1"], wqkv)

    # -------- kernel 2: causal attention + MLP (fully parallel grid) --------
    attn_flops = 2 * 2 * T * T * C * (NQ + 1) // (2 * NQ)     # QK^T + PV over live blocks
    flops = int(B * (attn_flops + 2 * T * C * C + 4 * T * C * HIDDEN))
    trans = int(B * N_HEAD * T * T * (NQ + 1) // (2 * NQ))
    bytes_acc = int(8 * B * T * C + 2 * B * T * 3 * C
                    + 2 * (C * C + 2 * C * HIDDEN) + 4 * (4 * C + HIDDEN))
    cost = pl.CostEstimate(flops=flops, transcendentals=trans, bytes_accessed=bytes_acc)

    full2d = lambda shape: pl.BlockSpec(shape, lambda b, qi: (0, 0))
    out = pl.pallas_call(
        attn_mlp_kernel,
        out_shape=jax.ShapeDtypeStruct((B, T, C), jnp.float32),
        grid_spec=pltpu.PrefetchScalarGridSpec(
            num_scalar_prefetch=0,
            grid=(B, NQ),
            in_specs=[
                pl.BlockSpec((1, TQ, C), lambda b, qi: (b, qi, 0)),     # x tile (residual)
                pl.BlockSpec((1, T, 3 * C), lambda b, qi: (b, 0, 0)),   # full-seq QKV (bf16)
                full2d((C, C)),          # Wproj (bf16)
                full2d((1, C)),          # bproj
                full2d((1, C)),          # ln2 gamma
                full2d((1, C)),          # ln2 beta
                full2d((C, HIDDEN)),     # W1 (bf16)
                full2d((1, HIDDEN)),     # b1
                full2d((HIDDEN, C)),     # W2 (bf16)
                full2d((1, C)),          # b2
            ],
            out_specs=pl.BlockSpec((1, TQ, C), lambda b, qi: (b, qi, 0)),
            scratch_shapes=[
                pltpu.VMEM((TQ, C), jnp.float32),            # sa / ff accumulator
                pltpu.VMEM((TQ, 1), jnp.float32),            # online-softmax running max
                pltpu.VMEM((TQ, 1), jnp.float32),            # online-softmax running denom
                pltpu.VMEM((TQ, HEAD_SIZE), jnp.float32),    # per-head output accumulator
            ],
        ),
        compiler_params=pltpu.CompilerParams(
            dimension_semantics=("parallel", "parallel")),
        cost_estimate=cost,
    )(x, qkv, wp, params["bp"], params["g2"], params["b2"],
      w1, params["bf1"], w2, params["bf2"])
    return out


def reference_forward(x, p):
    """Pure-JAX f32 reference mirroring the PyTorch Block.forward (eval mode)."""
    def ln(v, g, b):
        mu = jnp.mean(v, -1, keepdims=True)
        var = jnp.mean((v - mu) ** 2, -1, keepdims=True)
        return (v - mu) / jnp.sqrt(var + LN_EPS) * g + b

    B, T, C = x.shape
    h = ln(x, p["g1"], p["b1"])
    q = h @ p["wq"]; k = h @ p["wk"]; v = h @ p["wv"]
    q = q.reshape(B, T, N_HEAD, HEAD_SIZE).transpose(0, 2, 1, 3)
    k = k.reshape(B, T, N_HEAD, HEAD_SIZE).transpose(0, 2, 1, 3)
    v = v.reshape(B, T, N_HEAD, HEAD_SIZE).transpose(0, 2, 1, 3)
    wei = jnp.einsum("bhqd,bhkd->bhqk", q, k) * (C ** -0.5)   # NOTE: scales by n_embed, like the PyTorch code
    mask = jnp.tril(jnp.ones((T, T), bool))
    wei = jnp.where(mask, wei, -jnp.inf)
    wei = jax.nn.softmax(wei, axis=-1)
    sa = jnp.einsum("bhqk,bhkd->bhqd", wei, v).transpose(0, 2, 1, 3).reshape(B, T, C)
    sa = sa @ p["wp"] + p["bp"]
    x1 = x + sa
    h2 = ln(x1, p["g2"], p["b2"])
    ff = jnp.maximum(h2 @ p["w1"] + p["bf1"], 0.0) @ p["w2"] + p["bf2"]
    return x1 + ff


if __name__ == "__main__":
    key = jax.random.PRNGKey(0)
    ks = jax.random.split(key, 12)

    B, T, C = 2, 256, N_EMBED      # T=256 exercises key-block streaming (TQ=128, NQ=2)
    x = jax.random.normal(ks[0], (B, T, C), jnp.float32)

    s = 0.02
    params = {
        "g1": 1.0 + 0.01 * jax.random.normal(ks[1], (1, C), jnp.float32),
        "b1": 0.01 * jax.random.normal(ks[2], (1, C), jnp.float32),
        "wq": s * jax.random.normal(ks[3], (C, C), jnp.float32),
        "wk": s * jax.random.normal(ks[4], (C, C), jnp.float32),
        "wv": s * jax.random.normal(ks[5], (C, C), jnp.float32),
        "wp": s * jax.random.normal(ks[6], (C, C), jnp.float32),
        "bp": s * jax.random.normal(ks[7], (1, C), jnp.float32),
        "g2": 1.0 + 0.01 * jax.random.normal(ks[8], (1, C), jnp.float32),
        "b2": 0.01 * jax.random.normal(ks[9], (1, C), jnp.float32),
        "w1": s * jax.random.normal(ks[10], (C, HIDDEN), jnp.float32),
        "bf1": jnp.zeros((1, HIDDEN), jnp.float32),
        "w2": s * jax.random.normal(ks[11], (HIDDEN, C), jnp.float32),
        "bf2": jnp.zeros((1, C), jnp.float32),
    }

    out = jax.block_until_ready(block_forward(x, params))
    ref = jax.block_until_ready(reference_forward(x, params))
    assert out.shape == (B, T, C)
    # bf16 MXU operands (f32 accumulation) + approx reciprocal -> loosened tolerance.
    assert jnp.allclose(out, ref, rtol=2e-2, atol=2e-2), "mismatch vs reference"
    print("KERNEL_OK")
</pallas_src>

<mosaic_0001>
module attributes {stable_mosaic.version = 11 : i64} {
  func.func @ln_qkv_kernel(%arg0: i32, %arg1: i32, %arg2: memref<1x128x128xf32, #tpu.memory_space<vmem>>, %arg3: memref<1x128xf32, #tpu.memory_space<vmem>>, %arg4: memref<1x128xf32, #tpu.memory_space<vmem>>, %arg5: memref<128x384xbf16, #tpu.memory_space<vmem>>, %arg6: memref<1x128x384xbf16, #tpu.memory_space<vmem>>) attributes {dimension_semantics = [#tpu.dimension_semantics<parallel>, #tpu.dimension_semantics<parallel>], iteration_bounds = array<i64: 2, 2>, scalar_prefetch = 0 : i64, scratch_operands = 0 : i64, tpu.core_type = #tpu.core_type<tc>, window_params = [{transform_indices = @transform_0, window_bounds = array<i64: 1, 128, 128>}, {pipeline_mode = #tpu.pipeline_mode<synchronous>, transform_indices = @transform_1, window_bounds = array<i64: 1, 128>}, {pipeline_mode = #tpu.pipeline_mode<synchronous>, transform_indices = @transform_2, window_bounds = array<i64: 1, 128>}, {pipeline_mode = #tpu.pipeline_mode<synchronous>, transform_indices = @transform_3, window_bounds = array<i64: 128, 384>}, {transform_indices = @transform_4, window_bounds = array<i64: 1, 128, 384>}]} {
    %c0 = arith.constant 0 : index
    %c0_0 = arith.constant 0 : index
    %c0_1 = arith.constant 0 : index
    %0 = vector.load %arg2[%c0, %c0_0, %c0_1] : memref<1x128x128xf32, #tpu.memory_space<vmem>>, vector<1x128x128xf32>
    %1 = vector.shape_cast %0 : vector<1x128x128xf32> to vector<128x128xf32>
    %c0_2 = arith.constant 0 : index
    %c0_3 = arith.constant 0 : index
    %2 = vector.load %arg3[%c0_2, %c0_3] : memref<1x128xf32, #tpu.memory_space<vmem>>, vector<1x128xf32>
    %c0_4 = arith.constant 0 : index
    %c0_5 = arith.constant 0 : index
    %3 = vector.load %arg4[%c0_4, %c0_5] : memref<1x128xf32, #tpu.memory_space<vmem>>, vector<1x128xf32>
    %cst = arith.constant dense<0.000000e+00> : vector<128xf32>
    %4 = vector.multi_reduction <add>, %1, %cst [1] : vector<128x128xf32> to vector<128xf32>
    %5 = vector.shape_cast %4 : vector<128xf32> to vector<128x1xf32>
    %cst_6 = arith.constant 1.280000e+02 : f32
    %6 = vector.broadcast %cst_6 : f32 to vector<128x1xf32>
    %7 = arith.divf %5, %6 : vector<128x1xf32>
    %8 = vector.broadcast %7 : vector<128x1xf32> to vector<128x128xf32>
    %9 = arith.subf %1, %8 : vector<128x128xf32>
    %10 = arith.mulf %9, %9 : vector<128x128xf32>
    %cst_7 = arith.constant dense<0.000000e+00> : vector<128xf32>
    %11 = vector.multi_reduction <add>, %10, %cst_7 [1] : vector<128x128xf32> to vector<128xf32>
    %12 = vector.shape_cast %11 : vector<128xf32> to vector<128x1xf32>
    %cst_8 = arith.constant 1.280000e+02 : f32
    %13 = vector.broadcast %cst_8 : f32 to vector<128x1xf32>
    %14 = arith.divf %12, %13 : vector<128x1xf32>
    %15 = vector.broadcast %7 : vector<128x1xf32> to vector<128x128xf32>
    %16 = arith.subf %1, %15 : vector<128x128xf32>
    %cst_9 = arith.constant 9.99999974E-6 : f32
    %17 = vector.broadcast %cst_9 : f32 to vector<128x1xf32>
    %18 = arith.addf %14, %17 : vector<128x1xf32>
    %19 = math.rsqrt %18 : vector<128x1xf32>
    %20 = vector.broadcast %19 : vector<128x1xf32> to vector<128x128xf32>
    %21 = arith.mulf %16, %20 : vector<128x128xf32>
    %22 = vector.broadcast %2 : vector<1x128xf32> to vector<128x128xf32>
    %23 = arith.mulf %21, %22 : vector<128x128xf32>
    %24 = vector.broadcast %3 : vector<1x128xf32> to vector<128x128xf32>
    %25 = arith.addf %23, %24 : vector<128x128xf32>
    %26 = arith.truncf %25 : vector<128x128xf32> to vector<128x128xbf16>
    %c0_10 = arith.constant 0 : index
    %c0_11 = arith.constant 0 : index
    %27 = vector.load %arg5[%c0_10, %c0_11] : memref<128x384xbf16, #tpu.memory_space<vmem>>, vector<128x128xbf16>
    %cst_12 = arith.constant dense<0.000000e+00> : vector<128x128xf32>
    %28 = tpu.matmul %26, %27, %cst_12 {dimension_numbers = #tpu.dot_dimension_numbers<[1], [0], [0], [1], [0, 0, 1, 1], [], []>} : vector<128x128xbf16>, vector<128x128xbf16>, vector<128x128xf32> -> vector<128x128xf32>
    %29 = arith.truncf %28 : vector<128x128xf32> to vector<128x128xbf16>
    %c0_13 = arith.constant 0 : index
    %c0_14 = arith.constant 0 : index
    %c0_15 = arith.constant 0 : index
    %30 = vector.load %arg6[%c0_13, %c0_14, %c0_15] : memref<1x128x384xbf16, #tpu.memory_space<vmem>>, vector<1x128x128xbf16>
    %31 = vector.shape_cast %30 : vector<1x128x128xbf16> to vector<128x128xbf16>
    %32 = vector.shape_cast %29 : vector<128x128xbf16> to vector<1x128x128xbf16>
    tpu.vector_store %arg6[%c0_13, %c0_14, %c0_15], %32 {strides = array<i32>} : memref<1x128x384xbf16, #tpu.memory_space<vmem>>, vector<1x128x128xbf16>,
    %c0_16 = arith.constant 0 : index
    %c128 = arith.constant 128 : index
    %33 = vector.load %arg5[%c0_16, %c128] : memref<128x384xbf16, #tpu.memory_space<vmem>>, vector<128x128xbf16>
    %cst_17 = arith.constant dense<0.000000e+00> : vector<128x128xf32>
    %34 = tpu.matmul %26, %33, %cst_17 {dimension_numbers = #tpu.dot_dimension_numbers<[1], [0], [0], [1], [0, 0, 1, 1], [], []>} : vector<128x128xbf16>, vector<128x128xbf16>, vector<128x128xf32> -> vector<128x128xf32>
    %35 = arith.truncf %34 : vector<128x128xf32> to vector<128x128xbf16>
    %c0_18 = arith.constant 0 : index
    %c0_19 = arith.constant 0 : index
    %c128_20 = arith.constant 128 : index
    %36 = vector.load %arg6[%c0_18, %c0_19, %c128_20] : memref<1x128x384xbf16, #tpu.memory_space<vmem>>, vector<1x128x128xbf16>
    %37 = vector.shape_cast %36 : vector<1x128x128xbf16> to vector<128x128xbf16>
    %38 = vector.shape_cast %35 : vector<128x128xbf16> to vector<1x128x128xbf16>
    tpu.vector_store %arg6[%c0_18, %c0_19, %c128_20], %38 {strides = array<i32>} : memref<1x128x384xbf16, #tpu.memory_space<vmem>>, vector<1x128x128xbf16>,
    %c0_21 = arith.constant 0 : index
    %c256 = arith.constant 256 : index
    %39 = vector.load %arg5[%c0_21, %c256] : memref<128x384xbf16, #tpu.memory_space<vmem>>, vector<128x128xbf16>
    %cst_22 = arith.constant dense<0.000000e+00> : vector<128x128xf32>
    %40 = tpu.matmul %26, %39, %cst_22 {dimension_numbers = #tpu.dot_dimension_numbers<[1], [0], [0], [1], [0, 0, 1, 1], [], []>} : vector<128x128xbf16>, vector<128x128xbf16>, vector<128x128xf32> -> vector<128x128xf32>
    %41 = arith.truncf %40 : vector<128x128xf32> to vector<128x128xbf16>
    %c0_23 = arith.constant 0 : index
    %c0_24 = arith.constant 0 : index
    %c256_25 = arith.constant 256 : index
    %42 = vector.load %arg6[%c0_23, %c0_24, %c256_25] : memref<1x128x384xbf16, #tpu.memory_space<vmem>>, vector<1x128x128xbf16>
    %43 = vector.shape_cast %42 : vector<1x128x128xbf16> to vector<128x128xbf16>
    %44 = vector.shape_cast %41 : vector<128x128xbf16> to vector<1x128x128xbf16>
    tpu.vector_store %arg6[%c0_23, %c0_24, %c256_25], %44 {strides = array<i32>} : memref<1x128x384xbf16, #tpu.memory_space<vmem>>, vector<1x128x128xbf16>,
    return
  }
  func.func @transform_0(%arg0: i32, %arg1: i32) -> (i32, i32, i32) {
    %c0_i32 = arith.constant 0 : i32
    %c0_i32_0 = arith.constant 0 : i32
    return %arg0, %arg1, %c0_i32 : i32, i32, i32
  }
  func.func @transform_1(%arg0: i32, %arg1: i32) -> (i32, i32) {
    %c0_i32 = arith.constant 0 : i32
    %c0_i32_0 = arith.constant 0 : i32
    %c0_i32_1 = arith.constant 0 : i32
    return %c0_i32, %c0_i32_0 : i32, i32
  }
  func.func @transform_2(%arg0: i32, %arg1: i32) -> (i32, i32) {
    %c0_i32 = arith.constant 0 : i32
    %c0_i32_0 = arith.constant 0 : i32
    %c0_i32_1 = arith.constant 0 : i32
    return %c0_i32, %c0_i32_0 : i32, i32
  }
  func.func @transform_3(%arg0: i32, %arg1: i32) -> (i32, i32) {
    %c0_i32 = arith.constant 0 : i32
    %c0_i32_0 = arith.constant 0 : i32
    %c0_i32_1 = arith.constant 0 : i32
    return %c0_i32, %c0_i32_0 : i32, i32
  }
  func.func @transform_4(%arg0: i32, %arg1: i32) -> (i32, i32, i32) {
    %c0_i32 = arith.constant 0 : i32
    %c0_i32_0 = arith.constant 0 : i32
    return %arg0, %arg1, %c0_i32 : i32, i32, i32
  }
}

</mosaic_0001>

<bundles_post_ra>
// kernel: tpu_custom_call.1
= control target key start
LH: loop header
LB: loop body
LE: loop exit
PB: predicated region body
PF: predicated region fallthrough
CT: control target
= control target key end

     0   :  { %s2481_s0 = inlined_call_operand.hbm [shape: f32[2,256,128], index: 0, kind: input, shape index: {}]   ;;  %s2482_s1 = inlined_call_operand.vmem [shape: f32[1,128], index: 1, kind: input, shape index: {}]   ;;  %s2483_s2 = inlined_call_operand.vmem [shape: f32[1,128], index: 2, kind: input, shape index: {}]   ;;  %s2484_s3 = inlined_call_operand.hbm [shape: bf16[128,384], index: 3, kind: input, shape index: {}]   ;;  %s2485_s4 = inlined_call_operand.hbm [shape: bf16[2,256,384], index: 4, kind: output, shape index: {}]  }
   0x1   :  { %2495 = sst [smem:[#allocation16_spill]] %s2484_s3 }
   0x2   :  { %9 = vsyncpa [#allocation3], 0 }
   0x3   :  { %11 = vsyncpa [#allocation3 + $0x1], 0 }
   0x4   :  { %12 = vsyncpa [#allocation6], 0 }
   0x5   :  { %13 = vsyncpa [#allocation4], 0 }
   0x6   :  { %15 = vsyncpa [#allocation4 + $0x1], 0  ;;  %s1988_s15 = smov 0   ;;  %s1990_s16 = smov 0  }
   0x7   :  { %s1992_s17 = smov 0   ;;  %s1994_s18 = smov 0  }
   0x8   :  { %s1996_s19 = smov 0   ;;  %s1998_s20 = smov 0  }
   0x9   :  { %s2000_s21 = smov 0   ;;  %s2002_s22 = smov 0  }
   0xa LB: > { %2496 = sst [smem:[#allocation11_spill]] %s1924_s15  ;;  %s1339_s23 = sadd.s32 4294967295, %s1952_s22   ;;  %s1952_s22 = sphi %s2002_s22, %s21_s22   ;;  %s1948_s21 = sphi %s2000_s21, %s2525_s21   ;;  %s1944_s20 = sphi %s1998_s20, %s2519_s20   ;;  %s1940_s19 = sphi %s1996_s19, %s2524_s19   ;;  %s1936_s18 = sphi %s1994_s18, %s2518_s18   ;;  %s1932_s17 = sphi %s1992_s17, %s2523_s17   ;;  %s1928_s16 = sphi %s1990_s16, %s2522_s16   ;;  %s1924_s15 = sphi %s1988_s15, %s2521_s15  }
   0xb   : > { %2497 = sst [smem:[#allocation12_spill]] %s1944_s20  ;;  %s1340_s24 = sadd.s32 4294967294, %s1952_s22  }
   0xc   : > { %p55_p0 = scmp.ne.s32.totalorder %s1928_s16, %s1924_s15  ;;  %p2032_p1 = scmp.eq.s32.totalorder %s1339_s23, 0 }
   0xd   : > { %p2036_p2 = scmp.eq.s32.totalorder %s1339_s23, 3  ;;  %p150_p3 = scmp.eq.s32.totalorder %s1340_s24, 3 }
   0xe   : > { %s2498_s25 = scalar_select %p2032_p1, 1, 0 }
   0xf   : > { %s2499_s26 = scalar_select %p2036_p2, 1, 0 }
  0x10   : > { %p2042_p4 = por %p2032_p1, %p55_p0  ;;  %p1341_p5 = scmp.ge.s32.totalorder %s1952_s22, 1 }
  0x11   : > { %p2047_p6 = por %p150_p3, %p55_p0  ;;  %p157_p7 = scmp.lt.s32.totalorder %s1952_s22, 5 }
  0x12   : > { %s2500_s27 = scalar_select %p2042_p4, 1, 0 }
  0x13   : > { %s2501_s28 = scalar_select %p2047_p6, 1, 0 }
  0x14   : > { %p2052_p8 = pnand %p1341_p5, %p157_p7  ;;  %s1954_s30 = smov [#allocation5]  }
  0x15   : > { %2502 = sst [smem:[#allocation13_spill]] %s2501_s28  ;;  %s175_s5 = sshll.u32 %s1954_s30, 4  ;;  %s176_s5 = int_to_ptr.vmem [resolvable:$true] %s175_s5 }
  0x16   : > { %s2503_s29 = scalar_select %p2052_p8, 1, 0 }
  0x17   : > { %p1649_p9 = pneg %p2052_p8  ;;  %s2505_s3 = sld [smem:[#allocation16_spill]] }
  0x19   : > { %p2060_p10 = pnand %p1649_p9, %p2032_p1 }
  0x1b   : > { %p1794_p12 = pneg %p2060_p10 }
  0x1d   : > { %s1792_s9 = scalar_lea.hbm %s2505_s3, 3072 }
  0x1e   : > { %p1793_p11 = scmp.ne.s32.totalorder %s2505_s3, %s1792_s9  ;;  %p1799_p3 = scmp.lt.u32.totalorder %s1792_s9, %s2505_s3 }
  0x20   : > { %p1795_p13 = pnand %p1794_p12, %p1793_p11 }
  0x22   : > { %p1796_p0 = pneg %p1795_p13 }
  0x24   : > { %p1801_p5 = pnand %p1799_p3, %p1796_p0 }
  0x26   : > { %1804 = shalt.err (!%p1801_p5)
}
  0x27   : > { %s1805_s14 = scalar_lea.vmem %s176_s5, 3072  ;;  %p1813_p1 = scmp.lt.s32.totalorder %s176_s5, %s176_s5 }
  0x28   : > { %p1806_p7 = scmp.ne.s32.totalorder %s176_s5, %s1805_s14  ;;  %p1814_p4 = scmp.lt.s32.totalorder %s1805_s14, %s1805_s14 }
  0x2a   : > { %p1808_p9 = pnand %p1806_p7, %p1794_p12  ;;  %p1815_p8 = por %p1814_p4, %p1813_p1 }
  0x2c   : > { %p1809_p6 = pneg %p1808_p9 }
  0x2e   : > { %p1816_p2 = pnand %p1815_p8, %p1809_p6 }
  0x30   : > { %1819 = shalt.err (!%p1816_p2)
}
  0x31   : > { %s1955_s23 = smov 192   ;;  %s1956_s24 = smov 12  }
  0x32   : > { %1652 = dma.hbm_to_vmem [thread:$0]  (!%p2060_p10), %s2505_s3, 3072, %s176_s5, [#allocation6], %s1955_s23, %s1955_s23, %s1956_s24  }
  0x33   : > { %s30_s8 = sadd.s32 1, %s1944_s20  ;;  %s33_s9 = sadd.s32 1, %s1948_s21 }
  0x34   : > { %p31_p1 = scmp.ge.s32.totalorder %s30_s8, 2  ;;  %s42_s10 = sadd.s32 1, %s1932_s17 }
  0x35   : > { %p49_p2 = scmp.ne.s32.totalorder %s1932_s17, %s1928_s16  ;;  %p50_p4 = scmp.eq.s32.totalorder %s1952_s22, 0 }
  0x36   : > { %s2527_s8 = smov (%p31_p1, %s30_s8), 0  ;;  %s2529_s9 = smov (!%p31_p1, %s33_s9), %s1948_s21 }
  0x37   : > { %2506 = sst [smem:[#allocation14_spill]] %s2527_s8  ;;  %s38_s11 = ssub.s32 %s1944_s20, %s2527_s8 }
  0x38   : > { %p35_p6 = scmp.ge.s32.totalorder %s2529_s9, 2  ;;  %p2507_p8 = scmp.ne.s32.totalorder %s2499_s26, 0 }
  0x39   : > { %p2097_p10 = por %p50_p4, %p49_p2  ;;  %p1662_p12 = scmp.lt.s32.totalorder %s1952_s22, 4 }
  0x3a   : > { %p2093_p11 = por %p2507_p8, %p49_p2  ;;  %s2531_s9 = smov (%p35_p6, %s2529_s9), 0 }
  0x3b   : > { %2510 = sst [smem:[#allocation15_spill]] %s2531_s9  ;;  %s189_s12 = sand.u32 1, %s1932_s17  }
  0x3c   : > { %s1345_s13 = sshll.u32 %s1944_s20, 4  ;;  %s37_s14 = ssub.s32 %s1948_s21, %s2531_s9 }
  0x3d   : > { %s39_s23 = sor.u32 %s38_s11, %s37_s14  ;;  %s1344_s24 = sshll.u32 %s189_s12, 7 }
  0x3e   : > { %p40_p13 = scmp.eq.s32.totalorder %s39_s23, 0  ;;  %s1346_s26 = sshll.u32 %s1948_s21, 5 }
  0x3f   : > { %s193_s30 = scalar_lea.vmem [#allocation2], %s1344_s24  ;;  %s199_s8 = sadd.s32 %s1346_s26, %s1345_s13 }
  0x40   : > { %s202_s7 = sshll.u32 %s193_s30, 4  ;;  %s1347_s28 = sshll.u32 %s199_s8, 7  ;;  %s2112_s7 = int_to_ptr.vmem [resolvable:$true] %s202_s7 }
  0x41   : > { %s2110_s3 = scalar_select %p40_p13, %s1932_s17, %s42_s10  }
  0x42   : > { %p2118_p0 = pnand %p1662_p12, %p2097_p10  ;;  %s2125_s11 = scalar_lea.hbm %s2481_s0, %s1347_s28 }
  0x43   : > { %s2127_s10 = scalar_lea.sflag [#allocation3], %s189_s12  ;;  %s1820_s8 = scalar_lea.hbm %s2125_s11, 2048 }
  0x44   : > { %p1821_p3 = scmp.ne.s32.totalorder %s2125_s11, %s1820_s8  ;;  %p1822_p5 = pneg %p2118_p0 }
  0x45   : > { %s1825_s9 = scalar_lea.hbm %s2481_s0, 8192  ;;  %p1826_p1 = scmp.lt.u32.totalorder %s2125_s11, %s2481_s0 }
  0x46   : > { %p1823_p7 = pnand %p1822_p5, %p1821_p3  ;;  %p1827_p2 = scmp.lt.u32.totalorder %s1825_s9, %s1820_s8 }
  0x47   : > { %p1829_p6 = scmp.lt.u32.totalorder %s1820_s8, %s2125_s11 }
  0x48   : > { %p1824_p9 = pneg %p1823_p7  ;;  %p1828_p4 = por %p1827_p2, %p1826_p1 }
  0x4a   : > { %p1830_p8 = por %p1829_p6, %p1828_p4 }
  0x4c   : > { %p1831_p10 = pnand %p1830_p8, %p1824_p9 }
  0x4e   : > { %1834 = shalt.err (!%p1831_p10)
}
  0x4f   : > { %s1835_s12 = scalar_lea.vmem %s2112_s7, 2048  ;;  %s1957_s14 = smov [#allocation2]  }
  0x50   : > { %p1836_p12 = scmp.ne.s32.totalorder %s2112_s7, %s1835_s12  ;;  %s1840_s23 = sshll.u32 %s1957_s14, 4  ;;  %s1841_s23 = int_to_ptr.vmem [resolvable:$false] %s1840_s23 }
  0x51   : > { %s1842_s24 = scalar_lea.vmem %s1841_s23, 4096  ;;  %p1843_p7 = scmp.lt.s32.totalorder %s2112_s7, %s1841_s23 }
  0x52   : > { %p1838_p13 = pnand %p1836_p12, %p1822_p5  ;;  %p1844_p1 = scmp.lt.s32.totalorder %s1842_s24, %s1835_s12 }
  0x54   : > { %p1839_p3 = pneg %p1838_p13  ;;  %p1845_p2 = por %p1844_p1, %p1843_p7 }
  0x56   : > { %p1846_p4 = pnand %p1845_p2, %p1839_p3 }
  0x58   : > { %1849 = shalt.err (!%p1846_p4)
}
  0x59   : > { %s1958_s26 = smov 128   ;;  %s1959_s30 = smov 8  }
  0x5a   : > { %1656 = dma.hbm_to_vmem [thread:$0]  (!%p2118_p0), %s2125_s11, 2048, %s2112_s7, %s2127_s10, %s1958_s26, %s1958_s26, %s1959_s30  }
  0x5b   : > { %p2512_p5 = scmp.ne.s32.totalorder %s2503_s29, 0 }
  0x5c   : > { %s2158_s8 = sand.u32 (!%p2512_p5), 1, %s1928_s16   ;;  %p2513_p9 = scmp.ne.s32.totalorder (!%p2512_p5), %s2500_s27, 0 }
  0x5d   : > { %214 = sbr.rel (%p2512_p5) target bundleno = 698 (0x2ba), region = 36  ;;  %s1349_s5 = sshll.u32 (!%p2512_p5), %s2158_s8, 7 }
  0x5e   : > { %s217_s20 = scalar_lea.sflag (!%p2512_p5), [#allocation3], %s2158_s8  ;;  %s2162_s9 = scalar_lea.vmem (!%p2512_p5), [#allocation2], %s1349_s5 }
  0x64   : > { %1911 = dma.done.wait (%p2513_p9), %s217_s20, 2048  }
  0x65   : > { %1913 = vsyncadd (%p2513_p9), %s217_s20, 4294965248  ;;  %p2514_p0 = scmp.ne.s32.totalorder %s2498_s25, 0 }
  0x67   : > { %1915 = dma.done.wait (%p2514_p0), [#allocation6], 3072  }
  0x68   : > { %1917 = vsyncadd (%p2514_p0), [#allocation6], 4294964224  ;;  %v252_v0 = vld [vmem:[%s2162_s9] sm:$0xff]  ;;  %v254_v1 = vld [vmem:[%s2162_s9 + $0x10] sm:$0xff]  ;;  %s1638_s7 = smul.u32 192, %s2158_s8  ;;  %s1223_s24 = scalar_lea.sflag [#allocation4], %s2158_s8 }
  0x69   : > { %270 = vadd.xlane.f32.xlu0 %v252_v0  ;;  %274 = vadd.xlane.f32.xlu1 %v254_v1  ;;  %v253_v2 = vld [vmem:[%s2162_s9 + $0x8] sm:$0xff]  ;;  %v255_v3 = vld [vmem:[%s2162_s9 + $0x18] sm:$0xff]  ;;  %v256_v4 = vld [vmem:[%s2162_s9 + $0x20] sm:$0xff]  ;;  %s1639_s10 = smul.u32 48, %s1936_s18  ;;  %s1960_s30 = smov [#allocation7]  }
  0x6a   : > { %v257_v5 = vld [vmem:[%s2162_s9 + $0x28] sm:$0xff]  ;;  %v258_v6 = vld [vmem:[%s2162_s9 + $0x30] sm:$0xff]  ;;  %v259_v7 = vld [vmem:[%s2162_s9 + $0x38] sm:$0xff]  ;;  %s2369_s11 = scalar_lea.vmem [#allocation7], %s1638_s7  ;;  %s1640_s28 = smul.u32 96, %s1940_s19 }
  0x6b   : > { %v2181_v8 = vld [vmem:[%s2162_s9 + $0x40] sm:$0xff]  ;;  %v2184_v9 = vld [vmem:[%s2162_s9 + $0x48] sm:$0xff]  ;;  %v2187_v10 = vld [vmem:[%s2162_s9 + $0x50] sm:$0xff]  ;;  %s1239_s19 = sshll.u32 %s2369_s11, 4  ;;  %s1854_s5 = sshll.u32 %s1960_s30, 4  ;;  %s2416_s19 = int_to_ptr.vmem [resolvable:$true] %s1239_s19  ;;  %s1855_s5 = int_to_ptr.vmem [resolvable:$false] %s1854_s5 }
  0x6c   : > { %v2190_v11 = vld [vmem:[%s2162_s9 + $0x58] sm:$0xff]  ;;  %v2197_v12 = vld [vmem:[%s2162_s9 + $0x60] sm:$0xff]  ;;  %v2200_v13 = vld [vmem:[%s2162_s9 + $0x68] sm:$0xff]  ;;  %s1236_s18 = sadd.s32 %s1640_s28, %s1639_s10  ;;  %s1850_s26 = scalar_lea.vmem %s2416_s19, 3072 }
  0x6d   : > { %272 = vadd.xlane.f32.xlu0 %v253_v2  ;;  %276 = vadd.xlane.f32.xlu1 %v255_v3  ;;  %v2205_v14 = vld [vmem:[%s2162_s9 + $0x70] sm:$0xff]  ;;  %v2208_v15 = vld [vmem:[%s2162_s9 + $0x78] sm:$0xff]  ;;  %v1736_v16 = vld [vmem:[#allocation5] ss:$12 sps:$4 sm:$0xff]   ;;  %s1427_s13 = sshll.u32 %s1236_s18, 6  ;;  %p1851_p6 = scmp.ne.s32.totalorder %s2416_s19, %s1850_s26 }
  0x6e   : > { %v1737_v17 = vld [vmem:[#allocation5 + $0x4] ss:$12 sps:$4 sm:$0xff]   ;;  %1526 = vmatprep.subr.bf16.mxu0 %v1736_v16  ;;  %v1739_v62 = vld [vmem:[#allocation5 + $0x1c] ss:$12 sps:$4 sm:$0xff]   ;;  %s2423_s23 = scalar_lea.hbm %s2485_s4, %s1427_s13  ;;  %s1856_s20 = scalar_lea.vmem %s1855_s5, 6144 }
  0x6f   : > { %1558 = vmatprep.subr.bf16.mxu1 %v1737_v17  ;;  %1527 = vmatpush3.bf16.msra.mxu0 %v1736_v16  ;;  %v1738_v61 = vld [vmem:[#allocation5 + $0x18] ss:$12 sps:$4 sm:$0xff]   ;;  %p1852_p8 = pnand %p1851_p6, %p2093_p11  ;;  %p1857_p12 = scmp.lt.s32.totalorder %s2416_s19, %s1855_s5 }
  0x70   : > { %1559 = vmatpush3.bf16.msra.mxu1 %v1737_v17  ;;  %1528 = vmatprep.subr.bf16.mxu0 %v1738_v61  ;;  %p1858_p13 = scmp.lt.s32.totalorder %s1856_s20, %s1850_s26 }
  0x71   : > { %278 = vadd.xlane.f32.xlu0 %v256_v4  ;;  %280 = vadd.xlane.f32.xlu1 %v257_v5  ;;  %p1853_p10 = pneg %p1852_p8 }
  0x72   : > { %1560 = vmatprep.subr.bf16.mxu1 %v1739_v62  ;;  %p1859_p3 = por %p1858_p13, %p1857_p12 }
  0x73   : > { %1529 = vmatpush3.bf16.msra.mxu0 %v1738_v61 }
  0x74   : > { %1561 = vmatpush3.bf16.msra.mxu1 %v1739_v62  ;;  %p1860_p7 = pnand %p1859_p3, %p1853_p10 }
  0x75   : > { %282 = vadd.xlane.f32.xlu0 %v258_v6  ;;  %284 = vadd.xlane.f32.xlu1 %v259_v7 }
  0x79   : > { %286 = vadd.xlane.f32.xlu0 %v2181_v8  ;;  %288 = vadd.xlane.f32.xlu1 %v2184_v9 }
  0x7d   : > { %290 = vadd.xlane.f32.xlu0 %v2187_v10  ;;  %292 = vadd.xlane.f32.xlu1 %v2190_v11 }
  0x81   : > { %294 = vadd.xlane.f32.xlu0 %v2197_v12  ;;  %296 = vadd.xlane.f32.xlu1 %v2200_v13 }
  0x85   : > { %298 = vadd.xlane.f32.xlu0 %v2205_v14  ;;  %300 = vadd.xlane.f32.xlu1 %v2208_v15 }
  0xf6   : > { %v271_v18 = vpop.xlane.xlu0 %270  ;;  %v275_v19 = vpop.xlane.xlu1 %274 }
  0xf7   : > { %v303_v20 = vmul.f32 0.0078125, %v271_v18  ;;  %v305_v21 = vmul.f32 0.0078125, %v275_v19 }
  0xf9   : > { %v2212_v22 = vsub.f32 %v252_v0, %v303_v20  ;;  %v2214_v23 = vsub.f32 %v254_v1, %v305_v21 }
  0xfa   : > { %v273_v24 = vpop.xlane.xlu0 %272  ;;  %v277_v25 = vpop.xlane.xlu1 %276 }
  0xfb   : > { %v304_v26 = vmul.f32 0.0078125, %v273_v24  ;;  %v335_v27 = vmul.f32 %v2212_v22, %v2212_v22  ;;  %v306_v28 = vmul.f32 0.0078125, %v277_v25  ;;  %v337_v31 = vmul.f32 %v2214_v23, %v2214_v23  ;;  %v1742_v24 = vld [vmem:[#allocation5 + $0x48] ss:$12 sps:$4 sm:$0xff]   ;;  %v1743_v25 = vld [vmem:[#allocation5 + $0x4c] ss:$12 sps:$4 sm:$0xff]  }
  0xfd   : > { %v2218_v29 = vsub.f32 %v253_v2, %v304_v26  ;;  %351 = vadd.xlane.f32.xlu0 %v335_v27  ;;  %v2220_v30 = vsub.f32 %v255_v3, %v306_v28  ;;  %v1744_v27 = vld [vmem:[#allocation5 + $0x60] ss:$12 sps:$4 sm:$0xff]   ;;  %v1746_v28 = vld [vmem:[#allocation5 + $0x78] ss:$12 sps:$4 sm:$0xff]  }
  0xfe   : > { %v279_v32 = vpop.xlane.xlu0 %278  ;;  %v281_v33 = vpop.xlane.xlu1 %280 }
  0xff   : > { %v307_v34 = vmul.f32 0.0078125, %v279_v32  ;;  %v336_v35 = vmul.f32 %v2218_v29, %v2218_v29  ;;  %v308_v36 = vmul.f32 0.0078125, %v281_v33  ;;  %v338_v39 = vmul.f32 %v2220_v30, %v2220_v30  ;;  %v1748_v32 = vld [vmem:[#allocation5 + $0x90] ss:$12 sps:$4 sm:$0xff]   ;;  %v1749_v33 = vld [vmem:[#allocation5 + $0x94] ss:$12 sps:$4 sm:$0xff]  }
 0x101   : > { %v2226_v37 = vsub.f32 %v256_v4, %v307_v34  ;;  %355 = vadd.xlane.f32.xlu0 %v337_v31  ;;  %353 = vadd.xlane.f32.xlu1 %v336_v35  ;;  %v2228_v38 = vsub.f32 %v257_v5, %v308_v36  ;;  %v1747_v31 = vld [vmem:[#allocation5 + $0x7c] ss:$12 sps:$4 sm:$0xff]   ;;  %v1751_v35 = vld [vmem:[#allocation5 + $0xac] ss:$12 sps:$4 sm:$0xff]  }
 0x102   : > { %v283_v40 = vpop.xlane.xlu0 %282  ;;  %v285_v41 = vpop.xlane.xlu1 %284  ;;  %v1750_v34 = vld [vmem:[#allocation5 + $0xa8] ss:$12 sps:$4 sm:$0xff]  }
 0x103   : > { %v309_v42 = vmul.f32 0.0078125, %v283_v40  ;;  %v339_v43 = vmul.f32 %v2226_v37, %v2226_v37  ;;  %v310_v44 = vmul.f32 0.0078125, %v285_v41  ;;  %v340_v47 = vmul.f32 %v2228_v38, %v2228_v38  ;;  %v2284_v36 = vld [vmem:[#allocation5 + $0x8] ss:$12 sps:$4 sm:$0xff]  }
 0x105   : > { %v2234_v45 = vsub.f32 %v258_v6, %v309_v42  ;;  %357 = vadd.xlane.f32.xlu1 %v338_v39  ;;  %359 = vadd.xlane.f32.xlu0 %v339_v43  ;;  %v2236_v46 = vsub.f32 %v259_v7, %v310_v44 }
 0x106   : > { %v287_v48 = vpop.xlane.xlu0 %286  ;;  %v289_v49 = vpop.xlane.xlu1 %288 }
 0x107   : > { %v311_v50 = vmul.f32 0.0078125, %v287_v48  ;;  %v341_v51 = vmul.f32 %v2234_v45, %v2234_v45  ;;  %v312_v52 = vmul.f32 0.0078125, %v289_v49  ;;  %v342_v55 = vmul.f32 %v2236_v46, %v2236_v46 }
 0x109   : > { %v2243_v53 = vsub.f32 %v2181_v8, %v311_v50  ;;  %361 = vadd.xlane.f32.xlu1 %v340_v47  ;;  %363 = vadd.xlane.f32.xlu0 %v341_v51  ;;  %v2246_v54 = vsub.f32 %v2184_v9, %v312_v52 }
 0x10a   : > { %v291_v56 = vpop.xlane.xlu0 %290  ;;  %v293_v57 = vpop.xlane.xlu1 %292 }
 0x10b   : > { %v313_v58 = vmul.f32 0.0078125, %v291_v56  ;;  %v343_v59 = vmul.f32 %v2243_v53, %v2243_v53  ;;  %v314_v60 = vmul.f32 0.0078125, %v293_v57  ;;  %v344_v1 = vmul.f32 %v2246_v54, %v2246_v54 }
 0x10d   : > { %v2253_v63 = vsub.f32 %v2187_v10, %v313_v58  ;;  %365 = vadd.xlane.f32.xlu1 %v342_v55  ;;  %367 = vadd.xlane.f32.xlu0 %v343_v59  ;;  %v2256_v0 = vsub.f32 %v2190_v11, %v314_v60  ;;  %v1740_v10 = vld [vmem:[#allocation5 + $0x30] ss:$12 sps:$4 sm:$0xff]   ;;  %v1741_v11 = vld [vmem:[#allocation5 + $0x34] ss:$12 sps:$4 sm:$0xff]  }
 0x10e   : > { %v295_v2 = vpop.xlane.xlu0 %294  ;;  %v297_v3 = vpop.xlane.xlu1 %296  ;;  %1530 = vmatprep.subr.bf16.mxu0 %v1740_v10  ;;  %1562 = vmatprep.subr.bf16.mxu1 %v1741_v11 }
 0x10f   : > { %v315_v4 = vmul.f32 0.0078125, %v295_v2  ;;  %v345_v5 = vmul.f32 %v2253_v63, %v2253_v63  ;;  %v316_v6 = vmul.f32 0.0078125, %v297_v3  ;;  %v346_v9 = vmul.f32 %v2256_v0, %v2256_v0  ;;  %1531 = vmatpush3.bf16.msra.mxu0 %v1740_v10  ;;  %1563 = vmatpush3.bf16.msra.mxu1 %v1741_v11  ;;  %v2292_v10 = vld [vmem:[%s2482_s1] ss:$0 sm:$0xff] }
 0x110   : > { %1532 = vmatprep.subr.bf16.mxu0 %v1742_v24  ;;  %1564 = vmatprep.subr.bf16.mxu1 %v1743_v25 }
 0x111   : > { %v2263_v7 = vsub.f32 %v2197_v12, %v315_v4  ;;  %369 = vadd.xlane.f32.xlu1 %v344_v1  ;;  %371 = vadd.xlane.f32.xlu0 %v345_v5  ;;  %v2266_v8 = vsub.f32 %v2200_v13, %v316_v6 }
 0x112   : > { %v299_v16 = vpop.xlane.xlu0 %298  ;;  %v301_v17 = vpop.xlane.xlu1 %300 }
 0x113   : > { %v317_v18 = vmul.f32 0.0078125, %v299_v16  ;;  %v347_v19 = vmul.f32 %v2263_v7, %v2263_v7  ;;  %v318_v20 = vmul.f32 0.0078125, %v301_v17  ;;  %v348_v21 = vmul.f32 %v2266_v8, %v2266_v8  ;;  %1533 = vmatpush3.bf16.msra.mxu0 %v1742_v24  ;;  %1565 = vmatpush3.bf16.msra.mxu1 %v1743_v25 }
 0x114   : > { %1534 = vmatprep.subr.bf16.mxu0 %v1744_v27 }
 0x115   : > { %v2273_v12 = vsub.f32 %v2205_v14, %v317_v18  ;;  %373 = vadd.xlane.f32.xlu1 %v346_v9  ;;  %375 = vadd.xlane.f32.xlu0 %v347_v19  ;;  %v2276_v13 = vsub.f32 %v2208_v15, %v318_v20  ;;  %v1745_v15 = vld [vmem:[#allocation5 + $0x64] ss:$12 sps:$4 sm:$0xff]  }
 0x116   : > { %1566 = vmatprep.subr.bf16.mxu1 %v1745_v15 }
 0x117   : > { %v349_v26 = vmul.f32 %v2273_v12, %v2273_v12  ;;  %v350_v14 = vmul.f32 %v2276_v13, %v2276_v13  ;;  %1535 = vmatpush3.bf16.msra.mxu0 %v1744_v27  ;;  %1567 = vmatpush3.bf16.msra.mxu1 %v1745_v15 }
 0x118   : > { %1536 = vmatprep.subr.bf16.mxu0 %v1746_v28  ;;  %1568 = vmatprep.subr.bf16.mxu1 %v1747_v31 }
 0x119   : > { %377 = vadd.xlane.f32.xlu1 %v348_v21  ;;  %379 = vadd.xlane.f32.xlu0 %v349_v26  ;;  %v2299_v26 = vld [vmem:[%s2483_s2] ss:$0 sm:$0xff] }
 0x11b   : > { %1537 = vmatpush3.bf16.msra.mxu0 %v1746_v28  ;;  %1569 = vmatpush3.bf16.msra.mxu1 %v1747_v31 }
 0x11c   : > { %1538 = vmatprep.subr.bf16.mxu0 %v1748_v32  ;;  %1570 = vmatprep.subr.bf16.mxu1 %v1749_v33 }
 0x11d   : > { %381 = vadd.xlane.f32.xlu1 %v350_v14 }
 0x11f   : > { %1539 = vmatpush3.bf16.msra.mxu0 %v1748_v32  ;;  %1571 = vmatpush3.bf16.msra.mxu1 %v1749_v33 }
 0x120   : > { %1540 = vmatprep.subr.bf16.mxu0 %v1750_v34  ;;  %1572 = vmatprep.subr.bf16.mxu1 %v1751_v35 }
 0x123   : > { %1541 = vmatpush3.bf16.msra.mxu0 %v1750_v34  ;;  %1573 = vmatpush3.bf16.msra.mxu1 %v1751_v35 }
 0x124   : > { %1590 = vmatprep.subr.bf16.mxu0 %v2284_v36  ;;  %1622 = vmatprep.subr.bf16.mxu1 %v2284_v36 }
 0x18a   : > { %v352_v39 = vpop.xlane.xlu0 %351 }
 0x18b   : > { %v383_v40 = vmul.f32 0.0078125, %v352_v39 }
 0x18d   : > { %v399_v41 = vadd.f32 1e-05, %v383_v40 }
 0x18e   : > { %v354_v42 = vpop.xlane.xlu1 %353  ;;  %v356_v43 = vpop.xlane.xlu0 %355 }
 0x18f   : > { %1760 = vrsqrt.f32 %v399_v41  ;;  %v384_v44 = vmul.f32 0.0078125, %v354_v42  ;;  %v385_v47 = vmul.f32 0.0078125, %v356_v43 }
 0x191   : > { %v400_v48 = vadd.f32 1e-05, %v384_v44  ;;  %v401_v49 = vadd.f32 1e-05, %v385_v47 }
 0x192   : > { %v358_v50 = vpop.xlane.xlu1 %357  ;;  %v360_v51 = vpop.xlane.xlu0 %359 }
 0x193   : > { %1762 = vrsqrt.f32 %v400_v48  ;;  %v386_v52 = vmul.f32 0.0078125, %v358_v50  ;;  %v387_v55 = vmul.f32 0.0078125, %v360_v51 }
 0x194   : > { %1764 = vrsqrt.f32 %v401_v49 }
 0x195   : > { %v402_v56 = vadd.f32 1e-05, %v386_v52  ;;  %v403_v57 = vadd.f32 1e-05, %v387_v55 }
 0x196   : > { %v362_v58 = vpop.xlane.xlu1 %361  ;;  %v364_v59 = vpop.xlane.xlu0 %363 }
 0x197   : > { %1766 = vrsqrt.f32 %v402_v56  ;;  %v388_v60 = vmul.f32 0.0078125, %v362_v58  ;;  %v389_v61 = vmul.f32 0.0078125, %v364_v59 }
 0x198   : > { %1768 = vrsqrt.f32 %v403_v57 }
 0x199   : > { %v1761_v62 = vpop.eup %1760  ;;  %v404_v1 = vadd.f32 1e-05, %v388_v60  ;;  %v405_v2 = vadd.f32 1e-05, %v389_v61  ;;  %v1753_v61 = vld [vmem:[#allocation5 + $0x20] ss:$12 sps:$4 sm:$0xff]  }
 0x19a   : > { %v366_v3 = vpop.xlane.xlu1 %365  ;;  %v368_v4 = vpop.xlane.xlu0 %367  ;;  %v431_v5 = vmul.f32 %v1761_v62, %v2212_v22 }
 0x19b   : > { %1770 = vrsqrt.f32 %v404_v1  ;;  %v390_v6 = vmul.f32 0.0078125, %v366_v3  ;;  %v391_v9 = vmul.f32 0.0078125, %v368_v4 }
 0x19c   : > { %1772 = vrsqrt.f32 %v405_v2  ;;  %v453_v24 = vmul.f32 %v2292_v10, %v431_v5 }
 0x19d   : > { %v1763_v11 = vpop.eup %1762  ;;  %v406_v16 = vadd.f32 1e-05, %v390_v6  ;;  %v407_v17 = vadd.f32 1e-05, %v391_v9 }
 0x19e   : > { %v1765_v18 = vpop.eup %1764  ;;  %v370_v19 = vpop.xlane.xlu1 %369  ;;  %v432_v21 = vmul.f32 %v1763_v11, %v2218_v29  ;;  %v475_v35 = vadd.f32 %v2299_v26, %v453_v24 }
 0x19f   : > { %v372_v20 = vpop.xlane.xlu0 %371  ;;  %1774 = vrsqrt.f32 %v406_v16  ;;  %v392_v22 = vmul.f32 0.0078125, %v370_v19  ;;  %v433_v14 = vmul.f32 %v1765_v18, %v2214_v23  ;;  %v1754_v18 = vld [vmem:[#allocation5 + $0x38] ss:$12 sps:$4 sm:$0xff]  }
 0x1a0   : > { %v393_v25 = vmul.f32 0.0078125, %v372_v20  ;;  %1776 = vrsqrt.f32 %v407_v17  ;;  %v454_v27 = vmul.f32 %v2292_v10, %v432_v21 }
 0x1a1   : > { %v1767_v15 = vpop.eup %1766  ;;  %v408_v28 = vadd.f32 1e-05, %v392_v22  ;;  %v455_v29 = vmul.f32 %v2292_v10, %v433_v14 }
 0x1a2   : > { %v409_v31 = vadd.f32 1e-05, %v393_v25  ;;  %v1769_v32 = vpop.eup %1768  ;;  %v374_v33 = vpop.xlane.xlu1 %373  ;;  %v476_v39 = vadd.f32 %v2299_v26, %v454_v27  ;;  %v434_v40 = vmul.f32 %v1767_v15, %v2220_v30  ;;  %v1755_v27 = vld [vmem:[#allocation5 + $0x50] ss:$12 sps:$4 sm:$0xff]  }
 0x1a3   : > { %v376_v34 = vpop.xlane.xlu0 %375  ;;  %1778 = vrsqrt.f32 %v408_v28  ;;  %v394_v41 = vmul.f32 0.0078125, %v374_v33  ;;  %v435_v44 = vmul.f32 %v1769_v32, %v2226_v37  ;;  %v477_v50 = vadd.f32 %v2299_v26, %v455_v29 }
 0x1a4   : > { %v395_v23 = vmul.f32 0.0078125, %v376_v34  ;;  %1780 = vrsqrt.f32 %v409_v31  ;;  %v2307_v42 = vpack.c.bf16 %v476_v39, %v475_v35  ;;  %v456_v43 = vmul.f32 %v2292_v10, %v434_v40  ;;  %v1756_v35 = vld [vmem:[#allocation5 + $0x68] ss:$12 sps:$4 sm:$0xff]  }
 0x1a5   : > { %v1771_v47 = vpop.eup %1770  ;;  %v410_v48 = vadd.f32 1e-05, %v394_v41  ;;  %v457_v57 = vmul.f32 %v2292_v10, %v435_v44 }
 0x1a6   : > { %v411_v49 = vadd.f32 1e-05, %v395_v23  ;;  %v1773_v51 = vpop.eup %1772  ;;  %v378_v52 = vpop.xlane.xlu1 %377  ;;  %1542 = vmatprep.mubr.bf16.mxu0 %v2307_v42  ;;  %1574 = vmatprep.mubr.bf16.mxu1 %v2307_v42  ;;  %v478_v55 = vadd.f32 %v2299_v26, %v456_v43  ;;  %v436_v56 = vmul.f32 %v1771_v47, %v2228_v38 }
 0x1a7   : > { %v380_v30 = vpop.xlane.xlu0 %379  ;;  %1782 = vrsqrt.f32 %v410_v48  ;;  %v396_v37 = vmul.f32 0.0078125, %v378_v52  ;;  %v437_v59 = vmul.f32 %v1773_v51, %v2234_v45  ;;  %v479_v4 = vadd.f32 %v2299_v26, %v457_v57  ;;  %v1757_v48 = vld [vmem:[#allocation5 + $0x80] ss:$12 sps:$4 sm:$0xff]  }
 0x1a8   : > { %v397_v58 = vmul.f32 0.0078125, %v380_v30  ;;  %1784 = vrsqrt.f32 %v411_v49  ;;  %v2318_v60 = vpack.c.bf16 %v478_v55, %v477_v50  ;;  %v458_v62 = vmul.f32 %v2292_v10, %v436_v56  ;;  %v1758_v55 = vld [vmem:[#allocation5 + $0x98] ss:$12 sps:$4 sm:$0xff]  }
 0x1a9   : > { %v1775_v1 = vpop.eup %1774  ;;  %v412_v2 = vadd.f32 1e-05, %v396_v37  ;;  %v459_v9 = vmul.f32 %v2292_v10, %v437_v59 }
 0x1aa   : > { %v413_v3 = vadd.f32 1e-05, %v397_v58  ;;  %v1777_v5 = vpop.eup %1776  ;;  %v382_v38 = vpop.xlane.xlu1 %381  ;;  %1543 = vmatmul.mubr.bf16.vlgmr.msra.gmra.mrb[0].mxu0 %v2318_v60  ;;  %1575 = vmatmul.mubr.bf16.vlgmr.msra.gmra.mrb[0].mxu1 %v2318_v60  ;;  %v480_v6 = vadd.f32 %v2299_v26, %v458_v62  ;;  %v438_v45 = vmul.f32 %v1775_v1, %v2236_v46  ;;  %v1759_v58 = vld [vmem:[#allocation5 + $0xb0] ss:$12 sps:$4 sm:$0xff]  }
 0x1ab   : > { %1786 = vrsqrt.f32 %v412_v2  ;;  %v398_v11 = vmul.f32 0.0078125, %v382_v38  ;;  %1591 = vmatpush3.bf16.msra.mxu0 %v2284_v36  ;;  %1630 = vmatpush3.bf16.msra.mxu1 %v2284_v36  ;;  %v439_v16 = vmul.f32 %v1777_v5, %v2243_v53  ;;  %v481_v36 = vadd.f32 %v2299_v26, %v459_v9 }
 0x1ac   : > { %1788 = vrsqrt.f32 %v413_v3  ;;  %1592 = vmatprep.subr.bf16.mxu0 %v1753_v61  ;;  %1623 = vmatprep.subr.bf16.mxu1 %v1753_v61  ;;  %v2330_v17 = vpack.c.bf16 %v480_v6, %v479_v4  ;;  %v460_v19 = vmul.f32 %v2292_v10, %v438_v45 }
 0x1ad   : > { %v1779_v20 = vpop.eup %1778  ;;  %v414_v46 = vadd.f32 1e-05, %v398_v11  ;;  %v461_v21 = vmul.f32 %v2292_v10, %v439_v16 }
 0x1ae   : > { %v1781_v24 = vpop.eup %1780  ;;  %1546 = vmatprep.mubr.bf16.mxu0 %v2330_v17  ;;  %1578 = vmatprep.mubr.bf16.mxu1 %v2330_v17  ;;  %v482_v53 = vadd.f32 %v2299_v26, %v460_v19  ;;  %v440_v22 = vmul.f32 %v1779_v20, %v2246_v54 }
 0x1af   : > { %1790 = vrsqrt.f32 %v414_v46  ;;  %1593 = vmatpush3.bf16.msra.mxu0 %v1753_v61  ;;  %1631 = vmatpush3.bf16.msra.mxu1 %v1753_v61  ;;  %v441_v25 = vmul.f32 %v1781_v24, %v2253_v63  ;;  %v483_v31 = vadd.f32 %v2299_v26, %v461_v21 }
 0x1b0   : > { %1594 = vmatprep.subr.bf16.mxu0 %v1754_v18  ;;  %1624 = vmatprep.subr.bf16.mxu1 %v1754_v18  ;;  %v2340_v14 = vpack.c.bf16 %v482_v53, %v481_v36  ;;  %v462_v15 = vmul.f32 %v2292_v10, %v440_v22 }
 0x1b1   : > { %v1783_v28 = vpop.eup %1782  ;;  %v463_v63 = vmul.f32 %v2292_v10, %v441_v25 }
 0x1b2   : > { %v1785_v29 = vpop.eup %1784  ;;  %1547 = vmatmul.mubr.bf16.gmra.mrb[4].mxu0 %v2340_v14  ;;  %1579 = vmatmul.mubr.bf16.gmra.mrb[4].mxu1 %v2340_v14  ;;  %v484_v54 = vadd.f32 %v2299_v26, %v462_v15  ;;  %v442_v32 = vmul.f32 %v1783_v28, %v2256_v0 }
 0x1b3   : > { %1595 = vmatpush3.bf16.msra.mxu0 %v1754_v18  ;;  %1632 = vmatpush3.bf16.msra.mxu1 %v1754_v18  ;;  %v443_v33 = vmul.f32 %v1785_v29, %v2263_v7  ;;  %v485_v0 = vadd.f32 %v2299_v26, %v463_v63 }
 0x1b4   : > { %1596 = vmatprep.subr.bf16.mxu0 %v1755_v27  ;;  %1625 = vmatprep.subr.bf16.mxu1 %v1755_v27  ;;  %v495_v34 = vpack.c.bf16 %v484_v54, %v483_v31  ;;  %v464_v39 = vmul.f32 %v2292_v10, %v442_v32 }
 0x1b5   : > { %v1787_v40 = vpop.eup %1786  ;;  %v465_v41 = vmul.f32 %v2292_v10, %v443_v33 }
 0x1b6   : > { %v1789_v23 = vpop.eup %1788  ;;  %1550 = vmatprep.mubr.bf16.mxu0 %v495_v34  ;;  %1582 = vmatprep.mubr.bf16.mxu1 %v495_v34  ;;  %v486_v43 = vadd.f32 %v2299_v26, %v464_v39  ;;  %v444_v44 = vmul.f32 %v1787_v40, %v2266_v8 }
 0x1b7   : > { %1597 = vmatpush3.bf16.msra.mxu0 %v1755_v27  ;;  %1633 = vmatpush3.bf16.msra.mxu1 %v1755_v27  ;;  %v445_v7 = vmul.f32 %v1789_v23, %v2273_v12  ;;  %v487_v51 = vadd.f32 %v2299_v26, %v465_v41 }
 0x1b8   : > { %1598 = vmatprep.subr.bf16.mxu0 %v1756_v35  ;;  %1626 = vmatprep.subr.bf16.mxu1 %v1756_v35  ;;  %v496_v47 = vpack.c.bf16 %v486_v43, %v485_v0  ;;  %v466_v49 = vmul.f32 %v2292_v10, %v444_v44 }
 0x1b9   : > { %v1791_v50 = vpop.eup %1790  ;;  %v467_v8 = vmul.f32 %v2292_v10, %v445_v7 }
 0x1ba   : > { %1551 = vmatmul.mubr.bf16.gmra.mrb[8].mxu0 %v496_v47  ;;  %1583 = vmatmul.mubr.bf16.gmra.mrb[8].mxu1 %v496_v47  ;;  %v488_v52 = vadd.f32 %v2299_v26, %v466_v49  ;;  %v446_v30 = vmul.f32 %v1791_v50, %v2276_v13 }
 0x1bb   : > { %1599 = vmatpush3.bf16.msra.mxu0 %v1756_v35  ;;  %1634 = vmatpush3.bf16.msra.mxu1 %v1756_v35  ;;  %v489_v57 = vadd.f32 %v2299_v26, %v467_v8 }
 0x1bc   : > { %1600 = vmatprep.subr.bf16.mxu0 %v1757_v48  ;;  %1627 = vmatprep.subr.bf16.mxu1 %v1757_v48  ;;  %v497_v12 = vpack.c.bf16 %v488_v52, %v487_v51  ;;  %v468_v56 = vmul.f32 %v2292_v10, %v446_v30 }
 0x1be   : > { %1554 = vmatprep.mubr.bf16.mxu0 %v497_v12  ;;  %1586 = vmatprep.mubr.bf16.mxu1 %v497_v12  ;;  %v490_v37 = vadd.f32 %v2299_v26, %v468_v56 }
 0x1bf   : > { %1601 = vmatpush3.bf16.msra.mxu0 %v1757_v48  ;;  %1635 = vmatpush3.bf16.msra.mxu1 %v1757_v48 }
 0x1c0   : > { %1602 = vmatprep.subr.bf16.mxu0 %v1758_v55  ;;  %1628 = vmatprep.subr.bf16.mxu1 %v1758_v55  ;;  %v498_v13 = vpack.c.bf16 %v490_v37, %v489_v57 }
 0x1c2   : > { %1555 = vmatmul.mubr.bf16.gmra.mrb[12].mxu0 %v498_v13  ;;  %1587 = vmatmul.mubr.bf16.gmra.mrb[12].mxu1 %v498_v13 }
 0x1c3   : > { %1603 = vmatpush3.bf16.msra.mxu0 %v1758_v55  ;;  %1636 = vmatpush3.bf16.msra.mxu1 %v1758_v55 }
 0x1c4   : > { %1606 = vmatprep.mubr.bf16.mxu0 %v2307_v42  ;;  %1614 = vmatprep.mubr.bf16.mxu1 %v495_v34 }
 0x1c5   : > { %1604 = vmatprep.subr.bf16.mxu0 %v1759_v58  ;;  %1629 = vmatprep.subr.bf16.mxu1 %v1759_v58 }
 0x1c7   : > { %1605 = vmatpush3.bf16.msra.mxu0 %v1759_v58  ;;  %1637 = vmatpush3.bf16.msra.mxu1 %v1759_v58 }
 0x1ca   : > { %1607 = vmatmul.mubr.bf16.vlgmr.msra.gmra.mrb[16].mxu0 %v2318_v60  ;;  %1615 = vmatmul.mubr.bf16.vlgmr.msra.gmra.mrb[16].mxu1 %v496_v47 }
 0x1cb   : > { %1610 = vmatprep.mubr.bf16.mxu0 %v2330_v17  ;;  %1618 = vmatprep.mubr.bf16.mxu1 %v497_v12 }
 0x1d2   : > { %1611 = vmatmul.mubr.bf16.gmra.mrb[20].mxu0 %v2340_v14  ;;  %1619 = vmatmul.mubr.bf16.gmra.mrb[20].mxu1 %v498_v13 }
 0x27d   : > { %v1544_v10 = vpop.f32.mrb[0].mxu0  ;;  %v1576_v26 = vpop.f32.mrb[0].mxu1 }
 0x27e   : > { %v1432_v59 = vpack.c.bf16 %v1544_v10, %v1544_v10  ;;  %v1448_v61 = vpack.c.bf16 %v1576_v26, %v1576_v26  ;;  %v597_v42 = vpop.f32.mrb[1].mxu0  ;;  %v838_v62 = vpop.f32.mrb[1].mxu1 }
 0x27f   : > { %v1430_v1 = vpack.c.bf16 %v597_v42, %v597_v42  ;;  %v1446_v2 = vpack.c.bf16 %v838_v62, %v838_v62  ;;  %v1545_v3 = vpop.f32.mrb[2].mxu0  ;;  %v1577_v4 = vpop.f32.mrb[2].mxu1 }
 0x280   : > { %726 = vst [vmem:[%s2369_s11 + $0x18] sm:$0xf] %v1432_v59  ;;  %967 = vst [vmem:[%s2369_s11 + $0x1c] sm:$0xf] %v1448_v61  ;;  %v1433_v60 = vpack.c.bf16 %v1545_v3, %v1545_v3  ;;  %v1449_v5 = vpack.c.bf16 %v1577_v4, %v1577_v4  ;;  %v600_v38 = vpop.f32.mrb[3].mxu0  ;;  %v841_v6 = vpop.f32.mrb[3].mxu1 }
 0x281   : > { %724 = vst [vmem:[%s2369_s11] sm:$0xf] %v1430_v1  ;;  %965 = vst [vmem:[%s2369_s11 + $0x4] sm:$0xf] %v1446_v2  ;;  %v1431_v45 = vpack.c.bf16 %v600_v38, %v600_v38  ;;  %v1447_v9 = vpack.c.bf16 %v841_v6, %v841_v6 }
 0x282   : > { %727 = vst [vmem:[%s2369_s11 + $0x24] sm:$0xf] %v1433_v60  ;;  %968 = vst [vmem:[%s2369_s11 + $0x28] sm:$0xf] %v1449_v5 }
 0x283   : > { %725 = vst [vmem:[%s2369_s11 + $0xc] sm:$0xf] %v1431_v45  ;;  %966 = vst [vmem:[%s2369_s11 + $0x10] sm:$0xf] %v1447_v9 }
 0x285   : > { %v1548_v11 = vpop.f32.mrb[4].mxu0  ;;  %v1580_v16 = vpop.f32.mrb[4].mxu1 }
 0x286   : > { %v1436_v17 = vpack.c.bf16 %v1548_v11, %v1548_v11  ;;  %v1452_v18 = vpack.c.bf16 %v1580_v16, %v1580_v16  ;;  %v613_v19 = vpop.f32.mrb[5].mxu0  ;;  %v854_v20 = vpop.f32.mrb[5].mxu1 }
 0x287   : > { %v1434_v46 = vpack.c.bf16 %v613_v19, %v613_v19  ;;  %v1450_v21 = vpack.c.bf16 %v854_v20, %v854_v20  ;;  %v1549_v24 = vpop.f32.mrb[6].mxu0  ;;  %v1581_v36 = vpop.f32.mrb[6].mxu1 }
 0x288   : > { %730 = vst [vmem:[%s2369_s11 + $0x48] sm:$0xf] %v1436_v17  ;;  %971 = vst [vmem:[%s2369_s11 + $0x4c] sm:$0xf] %v1452_v18  ;;  %v1437_v53 = vpack.c.bf16 %v1549_v24, %v1549_v24  ;;  %v1453_v22 = vpack.c.bf16 %v1581_v36, %v1581_v36  ;;  %v616_v25 = vpop.f32.mrb[7].mxu0  ;;  %v857_v14 = vpop.f32.mrb[7].mxu1 }
 0x289   : > { %728 = vst [vmem:[%s2369_s11 + $0x30] sm:$0xf] %v1434_v46  ;;  %969 = vst [vmem:[%s2369_s11 + $0x34] sm:$0xf] %v1450_v21  ;;  %v1435_v27 = vpack.c.bf16 %v616_v25, %v616_v25  ;;  %v1451_v15 = vpack.c.bf16 %v857_v14, %v857_v14 }
 0x28a   : > { %731 = vst [vmem:[%s2369_s11 + $0x54] sm:$0xf] %v1437_v53  ;;  %972 = vst [vmem:[%s2369_s11 + $0x58] sm:$0xf] %v1453_v22 }
 0x28b   : > { %729 = vst [vmem:[%s2369_s11 + $0x3c] sm:$0xf] %v1435_v27  ;;  %970 = vst [vmem:[%s2369_s11 + $0x40] sm:$0xf] %v1451_v15 }
 0x28d   : > { %v1552_v28 = vpop.f32.mrb[8].mxu0  ;;  %v1584_v31 = vpop.f32.mrb[8].mxu1 }
 0x28e   : > { %v1440_v29 = vpack.c.bf16 %v1552_v28, %v1552_v28  ;;  %v1456_v54 = vpack.c.bf16 %v1584_v31, %v1584_v31  ;;  %v629_v32 = vpop.f32.mrb[9].mxu0  ;;  %v870_v63 = vpop.f32.mrb[9].mxu1 }
 0x28f   : > { %v1438_v33 = vpack.c.bf16 %v629_v32, %v629_v32  ;;  %v1454_v34 = vpack.c.bf16 %v870_v63, %v870_v63  ;;  %v1553_v35 = vpop.f32.mrb[10].mxu0  ;;  %v1585_v39 = vpop.f32.mrb[10].mxu1 }
 0x290   : > { %734 = vst [vmem:[%s2369_s11 + $0x78] sm:$0xf] %v1440_v29  ;;  %975 = vst [vmem:[%s2369_s11 + $0x7c] sm:$0xf] %v1456_v54  ;;  %v1441_v40 = vpack.c.bf16 %v1553_v35, %v1553_v35  ;;  %v1457_v41 = vpack.c.bf16 %v1585_v39, %v1585_v39  ;;  %v632_v23 = vpop.f32.mrb[11].mxu0  ;;  %v873_v0 = vpop.f32.mrb[11].mxu1 }
 0x291   : > { %732 = vst [vmem:[%s2369_s11 + $0x60] sm:$0xf] %v1438_v33  ;;  %973 = vst [vmem:[%s2369_s11 + $0x64] sm:$0xf] %v1454_v34  ;;  %v1439_v43 = vpack.c.bf16 %v632_v23, %v632_v23  ;;  %v1455_v44 = vpack.c.bf16 %v873_v0, %v873_v0 }
 0x292   : > { %735 = vst [vmem:[%s2369_s11 + $0x84] sm:$0xf] %v1441_v40  ;;  %976 = vst [vmem:[%s2369_s11 + $0x88] sm:$0xf] %v1457_v41 }
 0x293   : > { %733 = vst [vmem:[%s2369_s11 + $0x6c] sm:$0xf] %v1439_v43  ;;  %974 = vst [vmem:[%s2369_s11 + $0x70] sm:$0xf] %v1455_v44 }
 0x295   : > { %v1556_v7 = vpop.f32.mrb[12].mxu0  ;;  %v1588_v47 = vpop.f32.mrb[12].mxu1 }
 0x296   : > { %v1444_v48 = vpack.c.bf16 %v1556_v7, %v1556_v7  ;;  %v1460_v49 = vpack.c.bf16 %v1588_v47, %v1588_v47  ;;  %v645_v50 = vpop.f32.mrb[13].mxu0  ;;  %v886_v51 = vpop.f32.mrb[13].mxu1 }
 0x297   : > { %v1442_v52 = vpack.c.bf16 %v645_v50, %v645_v50  ;;  %v1458_v30 = vpack.c.bf16 %v886_v51, %v886_v51  ;;  %v1557_v8 = vpop.f32.mrb[14].mxu0  ;;  %v1589_v12 = vpop.f32.mrb[14].mxu1 }
 0x298   : > { %738 = vst [vmem:[%s2369_s11 + $0xa8] sm:$0xf] %v1444_v48  ;;  %979 = vst [vmem:[%s2369_s11 + $0xac] sm:$0xf] %v1460_v49  ;;  %v1445_v55 = vpack.c.bf16 %v1557_v8, %v1557_v8  ;;  %v1461_v56 = vpack.c.bf16 %v1589_v12, %v1589_v12  ;;  %v648_v57 = vpop.f32.mrb[15].mxu0  ;;  %v889_v37 = vpop.f32.mrb[15].mxu1 }
 0x299   : > { %736 = vst [vmem:[%s2369_s11 + $0x90] sm:$0xf] %v1442_v52  ;;  %977 = vst [vmem:[%s2369_s11 + $0x94] sm:$0xf] %v1458_v30  ;;  %v1443_v13 = vpack.c.bf16 %v648_v57, %v648_v57  ;;  %v1459_v58 = vpack.c.bf16 %v889_v37, %v889_v37 }
 0x29a   : > { %739 = vst [vmem:[%s2369_s11 + $0xb4] sm:$0xf] %v1445_v55  ;;  %980 = vst [vmem:[%s2369_s11 + $0xb8] sm:$0xf] %v1461_v56 }
 0x29b   : > { %737 = vst [vmem:[%s2369_s11 + $0x9c] sm:$0xf] %v1443_v13  ;;  %978 = vst [vmem:[%s2369_s11 + $0xa0] sm:$0xf] %v1459_v58 }
 0x29d   : > { %v1608_v10 = vpop.f32.mrb[16].mxu0  ;;  %v1616_v26 = vpop.f32.mrb[16].mxu1 }
 0x29e   : > { %v1464_v59 = vpack.c.bf16 %v1608_v10, %v1608_v10  ;;  %v1472_v61 = vpack.c.bf16 %v1616_v26, %v1616_v26  ;;  %v1079_v42 = vpop.f32.mrb[17].mxu0  ;;  %v1111_v62 = vpop.f32.mrb[17].mxu1 }
 0x29f   : > { %v1462_v1 = vpack.c.bf16 %v1079_v42, %v1079_v42  ;;  %v1470_v2 = vpack.c.bf16 %v1111_v62, %v1111_v62  ;;  %v1609_v3 = vpop.f32.mrb[18].mxu0  ;;  %v1617_v4 = vpop.f32.mrb[18].mxu1 }
 0x2a0   : > { %1208 = vst [vmem:[%s2369_s11 + $0x20] sm:$0xf] %v1464_v59  ;;  %1216 = vst [vmem:[%s2369_s11 + $0x80] sm:$0xf] %v1472_v61  ;;  %v1465_v60 = vpack.c.bf16 %v1609_v3, %v1609_v3  ;;  %v1473_v5 = vpack.c.bf16 %v1617_v4, %v1617_v4  ;;  %v1082_v38 = vpop.f32.mrb[19].mxu0  ;;  %v1114_v6 = vpop.f32.mrb[19].mxu1 }
 0x2a1   : > { %1206 = vst [vmem:[%s2369_s11 + $0x8] sm:$0xf] %v1462_v1  ;;  %1214 = vst [vmem:[%s2369_s11 + $0x68] sm:$0xf] %v1470_v2  ;;  %v1463_v45 = vpack.c.bf16 %v1082_v38, %v1082_v38  ;;  %v1471_v9 = vpack.c.bf16 %v1114_v6, %v1114_v6 }
 0x2a2   : > { %1209 = vst [vmem:[%s2369_s11 + $0x2c] sm:$0xf] %v1465_v60  ;;  %1217 = vst [vmem:[%s2369_s11 + $0x8c] sm:$0xf] %v1473_v5 }
 0x2a3   : > { %1207 = vst [vmem:[%s2369_s11 + $0x14] sm:$0xf] %v1463_v45  ;;  %1215 = vst [vmem:[%s2369_s11 + $0x74] sm:$0xf] %v1471_v9 }
 0x2a5   : > { %v1612_v11 = vpop.f32.mrb[20].mxu0  ;;  %v1620_v16 = vpop.f32.mrb[20].mxu1 }
 0x2a6   : > { %v1468_v17 = vpack.c.bf16 %v1612_v11, %v1612_v11  ;;  %v1476_v18 = vpack.c.bf16 %v1620_v16, %v1620_v16  ;;  %v1095_v19 = vpop.f32.mrb[21].mxu0  ;;  %v1127_v20 = vpop.f32.mrb[21].mxu1 }
 0x2a7   : > { %v1466_v46 = vpack.c.bf16 %v1095_v19, %v1095_v19  ;;  %v1474_v21 = vpack.c.bf16 %v1127_v20, %v1127_v20  ;;  %v1613_v24 = vpop.f32.mrb[22].mxu0  ;;  %v1621_v36 = vpop.f32.mrb[22].mxu1 }
 0x2a8   : > { %1212 = vst [vmem:[%s2369_s11 + $0x50] sm:$0xf] %v1468_v17  ;;  %1220 = vst [vmem:[%s2369_s11 + $0xb0] sm:$0xf] %v1476_v18  ;;  %v1469_v53 = vpack.c.bf16 %v1613_v24, %v1613_v24  ;;  %v1477_v22 = vpack.c.bf16 %v1621_v36, %v1621_v36  ;;  %v1098_v25 = vpop.f32.mrb[23].mxu0  ;;  %v1130_v14 = vpop.f32.mrb[23].mxu1 }
 0x2a9   : > { %1210 = vst [vmem:[%s2369_s11 + $0x38] sm:$0xf] %v1466_v46  ;;  %1218 = vst [vmem:[%s2369_s11 + $0x98] sm:$0xf] %v1474_v21  ;;  %v1467_v27 = vpack.c.bf16 %v1098_v25, %v1098_v25  ;;  %v1475_v15 = vpack.c.bf16 %v1130_v14, %v1130_v14 }
 0x2aa   : > { %1213 = vst [vmem:[%s2369_s11 + $0x5c] sm:$0xf] %v1469_v53  ;;  %1221 = vst [vmem:[%s2369_s11 + $0xbc] sm:$0xf] %v1477_v22 }
 0x2ab   : > { %1211 = vst [vmem:[%s2369_s11 + $0x44] sm:$0xf] %v1467_v27  ;;  %1219 = vst [vmem:[%s2369_s11 + $0xa4] sm:$0xf] %v1475_v15 }
 0x2ac   : > { %1863 = shalt.err (!%p1860_p7)
}
 0x2ad   : > { %s1864_s9 = scalar_lea.hbm %s2423_s23, 3072  ;;  %s1868_s27 = scalar_lea.hbm %s2485_s4, 12288 }
 0x2ae   : > { %p1865_p1 = scmp.ne.s32.totalorder %s2423_s23, %s1864_s9  ;;  %p1869_p5 = scmp.lt.u32.totalorder %s2423_s23, %s2485_s4 }
 0x2af   : > { %p1870_p9 = scmp.lt.u32.totalorder %s1868_s27, %s1864_s9  ;;  %p1872_p6 = scmp.lt.u32.totalorder %s1864_s9, %s2423_s23 }
 0x2b0   : > { %p1866_p2 = pnand %p1865_p1, %p2093_p11 }
 0x2b1   : > { %p1871_p0 = por %p1870_p9, %p1869_p5 }
 0x2b2   : > { %p1867_p4 = pneg %p1866_p2 }
 0x2b3   : > { %p1873_p8 = por %p1872_p6, %p1871_p0 }
 0x2b5   : > { %p1874_p10 = pnand %p1873_p8, %p1867_p4 }
 0x2b7   : > { %1877 = shalt.err (!%p1874_p10)
}
 0x2b8   : > { %s1961_s11 = smov 192   ;;  %s1962_s10 = smov 12  }
 0x2b9   : > { %1647 = dma.vmem_to_hbm [thread:$0]  (%p2093_p11), %s2416_s19, 3072, %s2423_s23, %s1223_s24, %s1961_s11, %s1961_s11, %s1962_s10  }
 0x2ba PF: > { %s2515_s28 = sld [smem:[#allocation11_spill]]  ;;  %s2516_s18 = sld [smem:[#allocation13_spill]] }
 0x2bb   : > { %p1664_p12 = scmp.ge.s32.totalorder %s1952_s22, 2 }
 0x2c0   : > { %s1254_s13 = sand.u32 1, %s2515_s28   ;;  %p2517_p13 = scmp.ne.s32.totalorder %s2516_s18, 0 }
 0x2c1   : > { %s1255_s12 = scalar_lea.sflag [#allocation4], %s1254_s13 }
 0x2c2   : > { %p1658_p3 = pnand %p1664_p12, %p2517_p13 }
 0x2c4   : > { %1919 = dma.done.wait (!%p1658_p3), %s1255_s12, 3072  }
 0x2c5   : > { %1921 = vsyncadd (!%p1658_p3), %s1255_s12, 4294964224  ;;  %s21_s22 = sadd.s32 1, %s1952_s22   ;;  %s2518_s18 = sld [smem:[#allocation12_spill]] }
 0x2c6   : > { %p18_p7 = scmp.ge.s32.totalorder %s21_s22, 6   ;;  %s2519_s20 = sld [smem:[#allocation14_spill]] }
 0x2c7   : > { %s2520_s6 = sld [smem:[#allocation15_spill]]  ;;  %s2521_s15 = smov %s1928_s16 }
 0x2c8   : > { %s2522_s16 = smov %s1932_s17  ;;  %s2523_s17 = smov %s2110_s3 }
 0x2c9   : > { %s2524_s19 = smov %s1948_s21  ;;  %20 = sbr.rel (!%p18_p7) target bundleno = 10 (0xa), region = 85 }
 0x2cd   : > { %s2525_s21 = smov %s2520_s6 }
 0x2d0   :  { %1260 = vsyncpa [#allocation3], 1 }
 0x2d1   :  { %1262 = vsyncpa [#allocation3 + $0x1], 1 }
 0x2d2   :  { %1263 = vsyncpa [#allocation6], 1 }
 0x2d3   :  { %1264 = vsyncpa [#allocation4], 1 }
 0x2d4   :  { %1266 = vsyncpa [#allocation4 + $0x1], 1 }

</bundles_post_ra>
